<compile_context>
chip_gen: v6e
topology: v6e:2x2x1
jax: 0.10.0
libtpu: 0.0.40
codegen_flags: <defaults>
</compile_context>

<pallas_src>
import functools

import jax
import jax.numpy as jnp
import numpy as np
from jax.experimental import pallas as pl
from jax.experimental.pallas import tpu as pltpu


def _round_up(x, m):
    return ((x + m - 1) // m) * m


def _mlp_kernel(num_layers, negative_slope, in_dims_pad, out_dims_pad, *refs):
    """Fused MLP forward on one batch tile.

    refs = (z_ref, w_0..w_{L-1}, b_0..b_{L-1}, out_ref, h_scratch)
      z_ref  : (TILE_B, D_in_pad)        VMEM, bf16 (or f32)
      w_i    : (D_in_pad_i, D_out_pad_i) VMEM, bf16, already (in, out) layout
      b_i    : (1, D_out_pad_i)          VMEM, f32
      out    : (TILE_B, D_out_pad)       VMEM, f32
      h      : (TILE_B, max_hidden_pad)  VMEM scratch, f32
    """
    z_ref = refs[0]
    w_refs = refs[1:1 + num_layers]
    b_refs = refs[1 + num_layers:1 + 2 * num_layers]
    out_ref = refs[1 + 2 * num_layers]
    h_ref = refs[2 + 2 * num_layers]

    mxu_dtype = w_refs[0].dtype

    for i in range(num_layers):
        if i == 0:
            x = z_ref[...]
        else:
            x = h_ref[:, : in_dims_pad[i]]
        x = x.astype(mxu_dtype)
        # bf16 x bf16 -> f32 accumulate on the MXU.
        y = jnp.dot(x, w_refs[i][...], preferred_element_type=jnp.float32)
        y = y + b_refs[i][...]
        if i < num_layers - 1:
            # LeakyReLU(0.2) in f32 on the VPU.
            y = jnp.where(y > 0, y, negative_slope * y)
            h_ref[:, : out_dims_pad[i]] = y
        else:
            out_ref[...] = y.astype(out_ref.dtype)


def prepare_mapping_network_params(weights, biases, compute_dtype=jnp.bfloat16):
    """One-time parameter prep (do this OUTSIDE the per-call hot path).

    weights[i]: (out_i, in_i) PyTorch layout; biases[i]: (out_i,).
    Returns padded, transposed (in, out) bf16 weights, f32 (1, out_pad) biases,
    and shape metadata.
    """
    num_layers = len(weights)
    w_pads, b_pads, in_dims, out_dims = [], [], [], []
    for w, b in zip(weights, biases):
        d_out, d_in = w.shape
        d_in_p = _round_up(d_in, 128)
        d_out_p = _round_up(d_out, 128)
        wt = jnp.zeros((d_in_p, d_out_p), compute_dtype)
        wt = wt.at[:d_in, :d_out].set(jnp.transpose(w).astype(compute_dtype))
        bp = jnp.zeros((1, d_out_p), jnp.float32)
        bp = bp.at[:, :d_out].set(b.astype(jnp.float32).reshape(1, -1))
        w_pads.append(wt)
        b_pads.append(bp)
        in_dims.append(d_in_p)
        out_dims.append(d_out_p)
    meta = dict(
        num_layers=num_layers,
        in_dims=tuple(in_dims),
        out_dims=tuple(out_dims),
        input_dim=int(weights[0].shape[1]),
        output_dim=int(weights[-1].shape[0]),
        compute_dtype=compute_dtype,
    )
    return tuple(w_pads), tuple(b_pads), meta


def mapping_network_forward(z, prepared_params, *, tile_b=512, negative_slope=0.2):
    """z: (B, input_dim) f32.  Returns (B, output_dim) f32."""
    w_pads, b_pads, meta = prepared_params
    num_layers = meta["num_layers"]
    in_dims, out_dims = meta["in_dims"], meta["out_dims"]
    d_in_p, d_out_p = in_dims[0], out_dims[-1]
    compute_dtype = meta["compute_dtype"]

    B, d_in = z.shape
    assert d_in == meta["input_dim"]

    # Batch tile: multiple of 8 sublanes, no larger than the (padded) batch.
    tb = max(8, min(_round_up(B, 8), _round_up(tile_b, 8)))
    B_pad = _round_up(B, tb)
    grid = (B_pad // tb,)

    # Pad z (rows -> B_pad, features -> lane multiple of 128) and cast the
    # activation stream to the MXU compute dtype (halves z HBM traffic).
    zp = jnp.zeros((B_pad, d_in_p), compute_dtype)
    zp = zp.at[:B, :d_in].set(z.astype(compute_dtype))

    max_hidden = max(out_dims[:-1]) if num_layers > 1 else 128

    in_specs = [pl.BlockSpec((tb, d_in_p), lambda i: (i, 0))]
    in_specs += [pl.BlockSpec(w.shape, lambda i: (0, 0)) for w in w_pads]
    in_specs += [pl.BlockSpec(b.shape, lambda i: (0, 0)) for b in b_pads]
    out_specs = pl.BlockSpec((tb, d_out_p), lambda i: (i, 0))

    # VMEM budget: resident weights/biases + double-buffered z/out tiles +
    # the f32 activation scratch. Keep the limit small enough for v7x (64 MiB).
    est = sum(int(np.prod(w.shape)) * w.dtype.itemsize for w in w_pads)
    est += sum(int(np.prod(b.shape)) * 4 for b in b_pads)
    est += 2 * tb * d_in_p * zp.dtype.itemsize   # double-buffered z tile
    est += 2 * tb * d_out_p * 4                  # double-buffered out tile
    est += tb * max_hidden * 4                   # h scratch
    vmem_limit = int(min(max(2 * est, 16 << 20), 48 << 20))

    kernel = functools.partial(
        _mlp_kernel, num_layers, negative_slope, in_dims, out_dims
    )
    out_padded = pl.pallas_call(
        kernel,
        out_shape=jax.ShapeDtypeStruct((B_pad, d_out_p), jnp.float32),
        grid=grid,
        in_specs=in_specs,
        out_specs=out_specs,
        scratch_shapes=[pltpu.VMEM((tb, max_hidden), jnp.float32)],
        compiler_params=pltpu.CompilerParams(
            dimension_semantics=("parallel",),
            vmem_limit_bytes=vmem_limit,
        ),
    )(zp, *w_pads, *b_pads)

    return out_padded[:B, : meta["output_dim"]]


def init_mapping_network_params(key, input_dim, output_dim, hidden_dim, num_layers):
    """Deterministic PyTorch-Linear-style init: U(-1/sqrt(fan_in), 1/sqrt(fan_in))."""
    dims_in = [input_dim] + [hidden_dim] * (num_layers - 1)
    dims_out = [hidden_dim] * (num_layers - 1) + [output_dim]
    weights, biases = [], []
    for d_in, d_out in zip(dims_in, dims_out):
        key, kw, kb = jax.random.split(key, 3)
        bound = 1.0 / np.sqrt(d_in)
        weights.append(
            jax.random.uniform(kw, (d_out, d_in), jnp.float32, -bound, bound)
        )
        biases.append(jax.random.uniform(kb, (d_out,), jnp.float32, -bound, bound))
    return weights, biases


def _reference_forward(z, weights, biases, negative_slope=0.2,
                       compute_dtype=jnp.bfloat16):
    """Pure-JAX reference mirroring the kernel numerics (bf16 MXU, f32 accum)."""
    h = z.astype(jnp.float32)
    n = len(weights)
    for i, (w, b) in enumerate(zip(weights, biases)):
        h = jnp.dot(
            h.astype(compute_dtype),
            jnp.transpose(w).astype(compute_dtype),
            preferred_element_type=jnp.float32,
        ) + b.astype(jnp.float32)
        if i < n - 1:
            h = jnp.where(h > 0, h, negative_slope * h)
    return h


if __name__ == "__main__":
    # Small shapes consistent with the module: num_layers=8 MLP mapping network.
    B, INPUT_DIM, HIDDEN_DIM, OUTPUT_DIM, NUM_LAYERS = 2, 32, 32, 32, 8

    key = jax.random.PRNGKey(0)
    key, kz = jax.random.split(key)
    z = jax.random.normal(kz, (B, INPUT_DIM), jnp.float32)

    weights, biases = init_mapping_network_params(
        key, INPUT_DIM, OUTPUT_DIM, HIDDEN_DIM, NUM_LAYERS
    )

    # One-time parameter prep (transpose / pad / bf16 cast) outside the hot path.
    prepared = prepare_mapping_network_params(weights, biases)

    out = mapping_network_forward(z, prepared)
    out = jax.block_until_ready(out)

    ref = jax.block_until_ready(_reference_forward(z, weights, biases))
    assert out.shape == (B, OUTPUT_DIM)
    np.testing.assert_allclose(np.asarray(out), np.asarray(ref), rtol=1e-3, atol=1e-3)

    print("KERNEL_OK")
</pallas_src>

<mosaic_0001>
module attributes {stable_mosaic.version = 11 : i64} {
  func.func @_mlp_kernel(%arg0: i32, %arg1: memref<8x128xbf16, #tpu.memory_space<vmem>>, %arg2: memref<128x128xbf16, #tpu.memory_space<vmem>>, %arg3: memref<128x128xbf16, #tpu.memory_space<vmem>>, %arg4: memref<128x128xbf16, #tpu.memory_space<vmem>>, %arg5: memref<128x128xbf16, #tpu.memory_space<vmem>>, %arg6: memref<128x128xbf16, #tpu.memory_space<vmem>>, %arg7: memref<128x128xbf16, #tpu.memory_space<vmem>>, %arg8: memref<128x128xbf16, #tpu.memory_space<vmem>>, %arg9: memref<128x128xbf16, #tpu.memory_space<vmem>>, %arg10: memref<1x128xf32, #tpu.memory_space<vmem>>, %arg11: memref<1x128xf32, #tpu.memory_space<vmem>>, %arg12: memref<1x128xf32, #tpu.memory_space<vmem>>, %arg13: memref<1x128xf32, #tpu.memory_space<vmem>>, %arg14: memref<1x128xf32, #tpu.memory_space<vmem>>, %arg15: memref<1x128xf32, #tpu.memory_space<vmem>>, %arg16: memref<1x128xf32, #tpu.memory_space<vmem>>, %arg17: memref<1x128xf32, #tpu.memory_space<vmem>>, %arg18: memref<8x128xf32, #tpu.memory_space<vmem>>, %arg19: memref<8x128xf32, #tpu.memory_space<vmem>>) attributes {dimension_semantics = [#tpu.dimension_semantics<parallel>], iteration_bounds = array<i64: 1>, scalar_prefetch = 0 : i64, scratch_operands = 1 : i64, tpu.core_type = #tpu.core_type<tc>, window_params = [{transform_indices = @transform_0, window_bounds = array<i64: 8, 128>}, {pipeline_mode = #tpu.pipeline_mode<synchronous>, transform_indices = @transform_1, window_bounds = array<i64: 128, 128>}, {pipeline_mode = #tpu.pipeline_mode<synchronous>, transform_indices = @transform_2, window_bounds = array<i64: 128, 128>}, {pipeline_mode = #tpu.pipeline_mode<synchronous>, transform_indices = @transform_3, window_bounds = array<i64: 128, 128>}, {pipeline_mode = #tpu.pipeline_mode<synchronous>, transform_indices = @transform_4, window_bounds = array<i64: 128, 128>}, {pipeline_mode = #tpu.pipeline_mode<synchronous>, transform_indices = @transform_5, window_bounds = array<i64: 128, 128>}, {pipeline_mode = #tpu.pipeline_mode<synchronous>, transform_indices = @transform_6, window_bounds = array<i64: 128, 128>}, {pipeline_mode = #tpu.pipeline_mode<synchronous>, transform_indices = @transform_7, window_bounds = array<i64: 128, 128>}, {pipeline_mode = #tpu.pipeline_mode<synchronous>, transform_indices = @transform_8, window_bounds = array<i64: 128, 128>}, {pipeline_mode = #tpu.pipeline_mode<synchronous>, transform_indices = @transform_9, window_bounds = array<i64: 1, 128>}, {pipeline_mode = #tpu.pipeline_mode<synchronous>, transform_indices = @transform_10, window_bounds = array<i64: 1, 128>}, {pipeline_mode = #tpu.pipeline_mode<synchronous>, transform_indices = @transform_11, window_bounds = array<i64: 1, 128>}, {pipeline_mode = #tpu.pipeline_mode<synchronous>, transform_indices = @transform_12, window_bounds = array<i64: 1, 128>}, {pipeline_mode = #tpu.pipeline_mode<synchronous>, transform_indices = @transform_13, window_bounds = array<i64: 1, 128>}, {pipeline_mode = #tpu.pipeline_mode<synchronous>, transform_indices = @transform_14, window_bounds = array<i64: 1, 128>}, {pipeline_mode = #tpu.pipeline_mode<synchronous>, transform_indices = @transform_15, window_bounds = array<i64: 1, 128>}, {pipeline_mode = #tpu.pipeline_mode<synchronous>, transform_indices = @transform_16, window_bounds = array<i64: 1, 128>}, {transform_indices = @transform_17, window_bounds = array<i64: 8, 128>}]} {
    %c0 = arith.constant 0 : index
    %c0_0 = arith.constant 0 : index
    %0 = vector.load %arg1[%c0, %c0_0] : memref<8x128xbf16, #tpu.memory_space<vmem>>, vector<8x128xbf16>
    %c0_1 = arith.constant 0 : index
    %c0_2 = arith.constant 0 : index
    %1 = vector.load %arg2[%c0_1, %c0_2] : memref<128x128xbf16, #tpu.memory_space<vmem>>, vector<128x128xbf16>
    %cst = arith.constant dense<0.000000e+00> : vector<8x128xf32>
    %2 = tpu.matmul %0, %1, %cst {dimension_numbers = #tpu.dot_dimension_numbers<[1], [0], [0], [1], [0, 0, 1, 1], [], []>} : vector<8x128xbf16>, vector<128x128xbf16>, vector<8x128xf32> -> vector<8x128xf32>
    %c0_3 = arith.constant 0 : index
    %c0_4 = arith.constant 0 : index
    %3 = vector.load %arg10[%c0_3, %c0_4] : memref<1x128xf32, #tpu.memory_space<vmem>>, vector<1x128xf32>
    %4 = vector.broadcast %3 : vector<1x128xf32> to vector<8x128xf32>
    %5 = arith.addf %2, %4 : vector<8x128xf32>
    %cst_5 = arith.constant 0.000000e+00 : f32
    %6 = vector.broadcast %cst_5 : f32 to vector<8x128xf32>
    %7 = arith.cmpf ogt, %5, %6 : vector<8x128xf32>
    %cst_6 = arith.constant 2.000000e-01 : f32
    %8 = vector.broadcast %cst_6 : f32 to vector<8x128xf32>
    %9 = arith.mulf %8, %5 : vector<8x128xf32>
    %10 = arith.select %7, %5, %9 : vector<8x128xi1>, vector<8x128xf32>
    %c0_7 = arith.constant 0 : index
    %c0_8 = arith.constant 0 : index
    %11 = vector.load %arg19[%c0_7, %c0_8] : memref<8x128xf32, #tpu.memory_space<vmem>>, vector<8x128xf32>
    tpu.vector_store %arg19[%c0_7, %c0_8], %10 {strides = array<i32>} : memref<8x128xf32, #tpu.memory_space<vmem>>, vector<8x128xf32>,
    %c0_9 = arith.constant 0 : index
    %c0_10 = arith.constant 0 : index
    %12 = vector.load %arg19[%c0_9, %c0_10] : memref<8x128xf32, #tpu.memory_space<vmem>>, vector<8x128xf32>
    %13 = arith.truncf %12 : vector<8x128xf32> to vector<8x128xbf16>
    %c0_11 = arith.constant 0 : index
    %c0_12 = arith.constant 0 : index
    %14 = vector.load %arg3[%c0_11, %c0_12] : memref<128x128xbf16, #tpu.memory_space<vmem>>, vector<128x128xbf16>
    %cst_13 = arith.constant dense<0.000000e+00> : vector<8x128xf32>
    %15 = tpu.matmul %13, %14, %cst_13 {dimension_numbers = #tpu.dot_dimension_numbers<[1], [0], [0], [1], [0, 0, 1, 1], [], []>} : vector<8x128xbf16>, vector<128x128xbf16>, vector<8x128xf32> -> vector<8x128xf32>
    %c0_14 = arith.constant 0 : index
    %c0_15 = arith.constant 0 : index
    %16 = vector.load %arg11[%c0_14, %c0_15] : memref<1x128xf32, #tpu.memory_space<vmem>>, vector<1x128xf32>
    %17 = vector.broadcast %16 : vector<1x128xf32> to vector<8x128xf32>
    %18 = arith.addf %15, %17 : vector<8x128xf32>
    %cst_16 = arith.constant 0.000000e+00 : f32
    %19 = vector.broadcast %cst_16 : f32 to vector<8x128xf32>
    %20 = arith.cmpf ogt, %18, %19 : vector<8x128xf32>
    %cst_17 = arith.constant 2.000000e-01 : f32
    %21 = vector.broadcast %cst_17 : f32 to vector<8x128xf32>
    %22 = arith.mulf %21, %18 : vector<8x128xf32>
    %23 = arith.select %20, %18, %22 : vector<8x128xi1>, vector<8x128xf32>
    %c0_18 = arith.constant 0 : index
    %c0_19 = arith.constant 0 : index
    %24 = vector.load %arg19[%c0_18, %c0_19] : memref<8x128xf32, #tpu.memory_space<vmem>>, vector<8x128xf32>
    tpu.vector_store %arg19[%c0_18, %c0_19], %23 {strides = array<i32>} : memref<8x128xf32, #tpu.memory_space<vmem>>, vector<8x128xf32>,
    %c0_20 = arith.constant 0 : index
    %c0_21 = arith.constant 0 : index
    %25 = vector.load %arg19[%c0_20, %c0_21] : memref<8x128xf32, #tpu.memory_space<vmem>>, vector<8x128xf32>
    %26 = arith.truncf %25 : vector<8x128xf32> to vector<8x128xbf16>
    %c0_22 = arith.constant 0 : index
    %c0_23 = arith.constant 0 : index
    %27 = vector.load %arg4[%c0_22, %c0_23] : memref<128x128xbf16, #tpu.memory_space<vmem>>, vector<128x128xbf16>
    %cst_24 = arith.constant dense<0.000000e+00> : vector<8x128xf32>
    %28 = tpu.matmul %26, %27, %cst_24 {dimension_numbers = #tpu.dot_dimension_numbers<[1], [0], [0], [1], [0, 0, 1, 1], [], []>} : vector<8x128xbf16>, vector<128x128xbf16>, vector<8x128xf32> -> vector<8x128xf32>
    %c0_25 = arith.constant 0 : index
    %c0_26 = arith.constant 0 : index
    %29 = vector.load %arg12[%c0_25, %c0_26] : memref<1x128xf32, #tpu.memory_space<vmem>>, vector<1x128xf32>
    %30 = vector.broadcast %29 : vector<1x128xf32> to vector<8x128xf32>
    %31 = arith.addf %28, %30 : vector<8x128xf32>
    %cst_27 = arith.constant 0.000000e+00 : f32
    %32 = vector.broadcast %cst_27 : f32 to vector<8x128xf32>
    %33 = arith.cmpf ogt, %31, %32 : vector<8x128xf32>
    %cst_28 = arith.constant 2.000000e-01 : f32
    %34 = vector.broadcast %cst_28 : f32 to vector<8x128xf32>
    %35 = arith.mulf %34, %31 : vector<8x128xf32>
    %36 = arith.select %33, %31, %35 : vector<8x128xi1>, vector<8x128xf32>
    %c0_29 = arith.constant 0 : index
    %c0_30 = arith.constant 0 : index
    %37 = vector.load %arg19[%c0_29, %c0_30] : memref<8x128xf32, #tpu.memory_space<vmem>>, vector<8x128xf32>
    tpu.vector_store %arg19[%c0_29, %c0_30], %36 {strides = array<i32>} : memref<8x128xf32, #tpu.memory_space<vmem>>, vector<8x128xf32>,
    %c0_31 = arith.constant 0 : index
    %c0_32 = arith.constant 0 : index
    %38 = vector.load %arg19[%c0_31, %c0_32] : memref<8x128xf32, #tpu.memory_space<vmem>>, vector<8x128xf32>
    %39 = arith.truncf %38 : vector<8x128xf32> to vector<8x128xbf16>
    %c0_33 = arith.constant 0 : index
    %c0_34 = arith.constant 0 : index
    %40 = vector.load %arg5[%c0_33, %c0_34] : memref<128x128xbf16, #tpu.memory_space<vmem>>, vector<128x128xbf16>
    %cst_35 = arith.constant dense<0.000000e+00> : vector<8x128xf32>
    %41 = tpu.matmul %39, %40, %cst_35 {dimension_numbers = #tpu.dot_dimension_numbers<[1], [0], [0], [1], [0, 0, 1, 1], [], []>} : vector<8x128xbf16>, vector<128x128xbf16>, vector<8x128xf32> -> vector<8x128xf32>
    %c0_36 = arith.constant 0 : index
    %c0_37 = arith.constant 0 : index
    %42 = vector.load %arg13[%c0_36, %c0_37] : memref<1x128xf32, #tpu.memory_space<vmem>>, vector<1x128xf32>
    %43 = vector.broadcast %42 : vector<1x128xf32> to vector<8x128xf32>
    %44 = arith.addf %41, %43 : vector<8x128xf32>
    %cst_38 = arith.constant 0.000000e+00 : f32
    %45 = vector.broadcast %cst_38 : f32 to vector<8x128xf32>
    %46 = arith.cmpf ogt, %44, %45 : vector<8x128xf32>
    %cst_39 = arith.constant 2.000000e-01 : f32
    %47 = vector.broadcast %cst_39 : f32 to vector<8x128xf32>
    %48 = arith.mulf %47, %44 : vector<8x128xf32>
    %49 = arith.select %46, %44, %48 : vector<8x128xi1>, vector<8x128xf32>
    %c0_40 = arith.constant 0 : index
    %c0_41 = arith.constant 0 : index
    %50 = vector.load %arg19[%c0_40, %c0_41] : memref<8x128xf32, #tpu.memory_space<vmem>>, vector<8x128xf32>
    tpu.vector_store %arg19[%c0_40, %c0_41], %49 {strides = array<i32>} : memref<8x128xf32, #tpu.memory_space<vmem>>, vector<8x128xf32>,
    %c0_42 = arith.constant 0 : index
    %c0_43 = arith.constant 0 : index
    %51 = vector.load %arg19[%c0_42, %c0_43] : memref<8x128xf32, #tpu.memory_space<vmem>>, vector<8x128xf32>
    %52 = arith.truncf %51 : vector<8x128xf32> to vector<8x128xbf16>
    %c0_44 = arith.constant 0 : index
    %c0_45 = arith.constant 0 : index
    %53 = vector.load %arg6[%c0_44, %c0_45] : memref<128x128xbf16, #tpu.memory_space<vmem>>, vector<128x128xbf16>
    %cst_46 = arith.constant dense<0.000000e+00> : vector<8x128xf32>
    %54 = tpu.matmul %52, %53, %cst_46 {dimension_numbers = #tpu.dot_dimension_numbers<[1], [0], [0], [1], [0, 0, 1, 1], [], []>} : vector<8x128xbf16>, vector<128x128xbf16>, vector<8x128xf32> -> vector<8x128xf32>
    %c0_47 = arith.constant 0 : index
    %c0_48 = arith.constant 0 : index
    %55 = vector.load %arg14[%c0_47, %c0_48] : memref<1x128xf32, #tpu.memory_space<vmem>>, vector<1x128xf32>
    %56 = vector.broadcast %55 : vector<1x128xf32> to vector<8x128xf32>
    %57 = arith.addf %54, %56 : vector<8x128xf32>
    %cst_49 = arith.constant 0.000000e+00 : f32
    %58 = vector.broadcast %cst_49 : f32 to vector<8x128xf32>
    %59 = arith.cmpf ogt, %57, %58 : vector<8x128xf32>
    %cst_50 = arith.constant 2.000000e-01 : f32
    %60 = vector.broadcast %cst_50 : f32 to vector<8x128xf32>
    %61 = arith.mulf %60, %57 : vector<8x128xf32>
    %62 = arith.select %59, %57, %61 : vector<8x128xi1>, vector<8x128xf32>
    %c0_51 = arith.constant 0 : index
    %c0_52 = arith.constant 0 : index
    %63 = vector.load %arg19[%c0_51, %c0_52] : memref<8x128xf32, #tpu.memory_space<vmem>>, vector<8x128xf32>
    tpu.vector_store %arg19[%c0_51, %c0_52], %62 {strides = array<i32>} : memref<8x128xf32, #tpu.memory_space<vmem>>, vector<8x128xf32>,
    %c0_53 = arith.constant 0 : index
    %c0_54 = arith.constant 0 : index
    %64 = vector.load %arg19[%c0_53, %c0_54] : memref<8x128xf32, #tpu.memory_space<vmem>>, vector<8x128xf32>
    %65 = arith.truncf %64 : vector<8x128xf32> to vector<8x128xbf16>
    %c0_55 = arith.constant 0 : index
    %c0_56 = arith.constant 0 : index
    %66 = vector.load %arg7[%c0_55, %c0_56] : memref<128x128xbf16, #tpu.memory_space<vmem>>, vector<128x128xbf16>
    %cst_57 = arith.constant dense<0.000000e+00> : vector<8x128xf32>
    %67 = tpu.matmul %65, %66, %cst_57 {dimension_numbers = #tpu.dot_dimension_numbers<[1], [0], [0], [1], [0, 0, 1, 1], [], []>} : vector<8x128xbf16>, vector<128x128xbf16>, vector<8x128xf32> -> vector<8x128xf32>
    %c0_58 = arith.constant 0 : index
    %c0_59 = arith.constant 0 : index
    %68 = vector.load %arg15[%c0_58, %c0_59] : memref<1x128xf32, #tpu.memory_space<vmem>>, vector<1x128xf32>
    %69 = vector.broadcast %68 : vector<1x128xf32> to vector<8x128xf32>
    %70 = arith.addf %67, %69 : vector<8x128xf32>
    %cst_60 = arith.constant 0.000000e+00 : f32
    %71 = vector.broadcast %cst_60 : f32 to vector<8x128xf32>
    %72 = arith.cmpf ogt, %70, %71 : vector<8x128xf32>
    %cst_61 = arith.constant 2.000000e-01 : f32
    %73 = vector.broadcast %cst_61 : f32 to vector<8x128xf32>
    %74 = arith.mulf %73, %70 : vector<8x128xf32>
    %75 = arith.select %72, %70, %74 : vector<8x128xi1>, vector<8x128xf32>
    %c0_62 = arith.constant 0 : index
    %c0_63 = arith.constant 0 : index
    %76 = vector.load %arg19[%c0_62, %c0_63] : memref<8x128xf32, #tpu.memory_space<vmem>>, vector<8x128xf32>
    tpu.vector_store %arg19[%c0_62, %c0_63], %75 {strides = array<i32>} : memref<8x128xf32, #tpu.memory_space<vmem>>, vector<8x128xf32>,
    %c0_64 = arith.constant 0 : index
    %c0_65 = arith.constant 0 : index
    %77 = vector.load %arg19[%c0_64, %c0_65] : memref<8x128xf32, #tpu.memory_space<vmem>>, vector<8x128xf32>
    %78 = arith.truncf %77 : vector<8x128xf32> to vector<8x128xbf16>
    %c0_66 = arith.constant 0 : index
    %c0_67 = arith.constant 0 : index
    %79 = vector.load %arg8[%c0_66, %c0_67] : memref<128x128xbf16, #tpu.memory_space<vmem>>, vector<128x128xbf16>
    %cst_68 = arith.constant dense<0.000000e+00> : vector<8x128xf32>
    %80 = tpu.matmul %78, %79, %cst_68 {dimension_numbers = #tpu.dot_dimension_numbers<[1], [0], [0], [1], [0, 0, 1, 1], [], []>} : vector<8x128xbf16>, vector<128x128xbf16>, vector<8x128xf32> -> vector<8x128xf32>
    %c0_69 = arith.constant 0 : index
    %c0_70 = arith.constant 0 : index
    %81 = vector.load %arg16[%c0_69, %c0_70] : memref<1x128xf32, #tpu.memory_space<vmem>>, vector<1x128xf32>
    %82 = vector.broadcast %81 : vector<1x128xf32> to vector<8x128xf32>
    %83 = arith.addf %80, %82 : vector<8x128xf32>
    %cst_71 = arith.constant 0.000000e+00 : f32
    %84 = vector.broadcast %cst_71 : f32 to vector<8x128xf32>
    %85 = arith.cmpf ogt, %83, %84 : vector<8x128xf32>
    %cst_72 = arith.constant 2.000000e-01 : f32
    %86 = vector.broadcast %cst_72 : f32 to vector<8x128xf32>
    %87 = arith.mulf %86, %83 : vector<8x128xf32>
    %88 = arith.select %85, %83, %87 : vector<8x128xi1>, vector<8x128xf32>
    %c0_73 = arith.constant 0 : index
    %c0_74 = arith.constant 0 : index
    %89 = vector.load %arg19[%c0_73, %c0_74] : memref<8x128xf32, #tpu.memory_space<vmem>>, vector<8x128xf32>
    tpu.vector_store %arg19[%c0_73, %c0_74], %88 {strides = array<i32>} : memref<8x128xf32, #tpu.memory_space<vmem>>, vector<8x128xf32>,
    %c0_75 = arith.constant 0 : index
    %c0_76 = arith.constant 0 : index
    %90 = vector.load %arg19[%c0_75, %c0_76] : memref<8x128xf32, #tpu.memory_space<vmem>>, vector<8x128xf32>
    %91 = arith.truncf %90 : vector<8x128xf32> to vector<8x128xbf16>
    %c0_77 = arith.constant 0 : index
    %c0_78 = arith.constant 0 : index
    %92 = vector.load %arg9[%c0_77, %c0_78] : memref<128x128xbf16, #tpu.memory_space<vmem>>, vector<128x128xbf16>
    %cst_79 = arith.constant dense<0.000000e+00> : vector<8x128xf32>
    %93 = tpu.matmul %91, %92, %cst_79 {dimension_numbers = #tpu.dot_dimension_numbers<[1], [0], [0], [1], [0, 0, 1, 1], [], []>} : vector<8x128xbf16>, vector<128x128xbf16>, vector<8x128xf32> -> vector<8x128xf32>
    %c0_80 = arith.constant 0 : index
    %c0_81 = arith.constant 0 : index
    %94 = vector.load %arg17[%c0_80, %c0_81] : memref<1x128xf32, #tpu.memory_space<vmem>>, vector<1x128xf32>
    %95 = vector.broadcast %94 : vector<1x128xf32> to vector<8x128xf32>
    %96 = arith.addf %93, %95 : vector<8x128xf32>
    %c0_82 = arith.constant 0 : index
    %c0_83 = arith.constant 0 : index
    %97 = vector.load %arg18[%c0_82, %c0_83] : memref<8x128xf32, #tpu.memory_space<vmem>>, vector<8x128xf32>
    tpu.vector_store %arg18[%c0_82, %c0_83], %96 {strides = array<i32>} : memref<8x128xf32, #tpu.memory_space<vmem>>, vector<8x128xf32>,
    return
  }
  func.func @transform_0(%arg0: i32) -> (i32, i32) {
    %c0_i32 = arith.constant 0 : i32
    %c0_i32_0 = arith.constant 0 : i32
    return %arg0, %c0_i32 : i32, i32
  }
  func.func @transform_1(%arg0: i32) -> (i32, i32) {
    %c0_i32 = arith.constant 0 : i32
    %c0_i32_0 = arith.constant 0 : i32
    %c0_i32_1 = arith.constant 0 : i32
    return %c0_i32, %c0_i32_0 : i32, i32
  }
  func.func @transform_2(%arg0: i32) -> (i32, i32) {
    %c0_i32 = arith.constant 0 : i32
    %c0_i32_0 = arith.constant 0 : i32
    %c0_i32_1 = arith.constant 0 : i32
    return %c0_i32, %c0_i32_0 : i32, i32
  }
  func.func @transform_3(%arg0: i32) -> (i32, i32) {
    %c0_i32 = arith.constant 0 : i32
    %c0_i32_0 = arith.constant 0 : i32
    %c0_i32_1 = arith.constant 0 : i32
    return %c0_i32, %c0_i32_0 : i32, i32
  }
  func.func @transform_4(%arg0: i32) -> (i32, i32) {
    %c0_i32 = arith.constant 0 : i32
    %c0_i32_0 = arith.constant 0 : i32
    %c0_i32_1 = arith.constant 0 : i32
    return %c0_i32, %c0_i32_0 : i32, i32
  }
  func.func @transform_5(%arg0: i32) -> (i32, i32) {
    %c0_i32 = arith.constant 0 : i32
    %c0_i32_0 = arith.constant 0 : i32
    %c0_i32_1 = arith.constant 0 : i32
    return %c0_i32, %c0_i32_0 : i32, i32
  }
  func.func @transform_6(%arg0: i32) -> (i32, i32) {
    %c0_i32 = arith.constant 0 : i32
    %c0_i32_0 = arith.constant 0 : i32
    %c0_i32_1 = arith.constant 0 : i32
    return %c0_i32, %c0_i32_0 : i32, i32
  }
  func.func @transform_7(%arg0: i32) -> (i32, i32) {
    %c0_i32 = arith.constant 0 : i32
    %c0_i32_0 = arith.constant 0 : i32
    %c0_i32_1 = arith.constant 0 : i32
    return %c0_i32, %c0_i32_0 : i32, i32
  }
  func.func @transform_8(%arg0: i32) -> (i32, i32) {
    %c0_i32 = arith.constant 0 : i32
    %c0_i32_0 = arith.constant 0 : i32
    %c0_i32_1 = arith.constant 0 : i32
    return %c0_i32, %c0_i32_0 : i32, i32
  }
  func.func @transform_9(%arg0: i32) -> (i32, i32) {
    %c0_i32 = arith.constant 0 : i32
    %c0_i32_0 = arith.constant 0 : i32
    %c0_i32_1 = arith.constant 0 : i32
    return %c0_i32, %c0_i32_0 : i32, i32
  }
  func.func @transform_10(%arg0: i32) -> (i32, i32) {
    %c0_i32 = arith.constant 0 : i32
    %c0_i32_0 = arith.constant 0 : i32
    %c0_i32_1 = arith.constant 0 : i32
    return %c0_i32, %c0_i32_0 : i32, i32
  }
  func.func @transform_11(%arg0: i32) -> (i32, i32) {
    %c0_i32 = arith.constant 0 : i32
    %c0_i32_0 = arith.constant 0 : i32
    %c0_i32_1 = arith.constant 0 : i32
    return %c0_i32, %c0_i32_0 : i32, i32
  }
  func.func @transform_12(%arg0: i32) -> (i32, i32) {
    %c0_i32 = arith.constant 0 : i32
    %c0_i32_0 = arith.constant 0 : i32
    %c0_i32_1 = arith.constant 0 : i32
    return %c0_i32, %c0_i32_0 : i32, i32
  }
  func.func @transform_13(%arg0: i32) -> (i32, i32) {
    %c0_i32 = arith.constant 0 : i32
    %c0_i32_0 = arith.constant 0 : i32
    %c0_i32_1 = arith.constant 0 : i32
    return %c0_i32, %c0_i32_0 : i32, i32
  }
  func.func @transform_14(%arg0: i32) -> (i32, i32) {
    %c0_i32 = arith.constant 0 : i32
    %c0_i32_0 = arith.constant 0 : i32
    %c0_i32_1 = arith.constant 0 : i32
    return %c0_i32, %c0_i32_0 : i32, i32
  }
  func.func @transform_15(%arg0: i32) -> (i32, i32) {
    %c0_i32 = arith.constant 0 : i32
    %c0_i32_0 = arith.constant 0 : i32
    %c0_i32_1 = arith.constant 0 : i32
    return %c0_i32, %c0_i32_0 : i32, i32
  }
  func.func @transform_16(%arg0: i32) -> (i32, i32) {
    %c0_i32 = arith.constant 0 : i32
    %c0_i32_0 = arith.constant 0 : i32
    %c0_i32_1 = arith.constant 0 : i32
    return %c0_i32, %c0_i32_0 : i32, i32
  }
  func.func @transform_17(%arg0: i32) -> (i32, i32) {
    %c0_i32 = arith.constant 0 : i32
    %c0_i32_0 = arith.constant 0 : i32
    return %arg0, %c0_i32 : i32, i32
  }
}

</mosaic_0001>

<bundles_post_ra>
// kernel: tpu_custom_call.1
= control target key start
LH: loop header
LB: loop body
LE: loop exit
PB: predicated region body
PF: predicated region fallthrough
CT: control target
= control target key end

     0   :  { %s1985_s0 = inlined_call_operand.hbm [shape: bf16[8,128], index: 0, kind: input, shape index: {}]   ;;  %s1986_s1 = inlined_call_operand.hbm [shape: bf16[128,128], index: 1, kind: input, shape index: {}]   ;;  %s1987_s2 = inlined_call_operand.hbm [shape: bf16[128,128], index: 2, kind: input, shape index: {}]   ;;  %s1988_s3 = inlined_call_operand.hbm [shape: bf16[128,128], index: 3, kind: input, shape index: {}]   ;;  %s1989_s4 = inlined_call_operand.hbm [shape: bf16[128,128], index: 4, kind: input, shape index: {}]   ;;  %s1990_s5 = inlined_call_operand.hbm [shape: bf16[128,128], index: 5, kind: input, shape index: {}]   ;;  %s1991_s6 = inlined_call_operand.hbm [shape: bf16[128,128], index: 6, kind: input, shape index: {}]   ;;  %s1992_s7 = inlined_call_operand.hbm [shape: bf16[128,128], index: 7, kind: input, shape index: {}]   ;;  %s1993_s8 = inlined_call_operand.hbm [shape: bf16[128,128], index: 8, kind: input, shape index: {}]   ;;  %s1994_s9 = inlined_call_operand.vmem [shape: f32[1,128], index: 9, kind: input, shape index: {}]   ;;  %s1995_s10 = inlined_call_operand.vmem [shape: f32[1,128], index: 10, kind: input, shape index: {}]   ;;  %s1996_s11 = inlined_call_operand.vmem [shape: f32[1,128], index: 11, kind: input, shape index: {}]   ;;  %s1997_s12 = inlined_call_operand.vmem [shape: f32[1,128], index: 12, kind: input, shape index: {}]   ;;  %s1998_s13 = inlined_call_operand.vmem [shape: f32[1,128], index: 13, kind: input, shape index: {}]   ;;  %s1999_s14 = inlined_call_operand.vmem [shape: f32[1,128], index: 14, kind: input, shape index: {}]   ;;  %s2000_s15 = inlined_call_operand.vmem [shape: f32[1,128], index: 15, kind: input, shape index: {}]   ;;  %s2001_s16 = inlined_call_operand.vmem [shape: f32[1,128], index: 16, kind: input, shape index: {}]   ;;  %s2002_s17 = inlined_call_operand.hbm [shape: f32[8,128], index: 17, kind: output, shape index: {}]  }
   0x1   :  { %2003 = sst [smem:[#allocation25_spill]] %s1985_s0 }
   0x2   :  { %2004 = sst [smem:[#allocation26_spill]] %s1986_s1 }
   0x3   :  { %22 = vsyncpa [#allocation4], 0 }
   0x4   :  { %23 = vsyncpa [#allocation7], 0 }
   0x5   :  { %24 = vsyncpa [#allocation10], 0 }
   0x6   :  { %25 = vsyncpa [#allocation13], 0 }
   0x7   :  { %26 = vsyncpa [#allocation16], 0 }
   0x8   :  { %27 = vsyncpa [#allocation5], 0  ;;  %s1723_s24 = smov [#allocation6]  }
   0x9   :  { %s43_s25 = sshll.u32 %s1723_s24, 4  ;;  %s44_s25 = int_to_ptr.vmem [resolvable:$true] %s43_s25 }
   0xa   :  { %s1519_s26 = scalar_lea.vmem %s44_s25, 1024  ;;  %p1524_p1 = scmp.lt.s32.totalorder %s44_s25, %s44_s25 }
   0xb   :  { %p1520_p0 = scmp.ne.s32.totalorder %s44_s25, %s1519_s26  ;;  %p1525_p2 = scmp.lt.s32.totalorder %s1519_s26, %s1519_s26 }
   0xd   :  { %p1526_p3 = por %p1525_p2, %p1524_p1 }
   0xf   :  { %p1527_p4 = pnand %p1526_p3, %p1520_p0 }
  0x11   :  { %1530 = shalt.err (!%p1527_p4)
}
  0x12   :  { %s1724_s27 = smov 64   ;;  %s1725_s28 = smov 4  }
  0x13   :  { %s2005_s30 = sld [smem:[#allocation26_spill]]  ;;  %s1726_s18 = smov [#allocation9]  }
  0x14   :  { %s67_s19 = sshll.u32 %s1726_s18, 4  ;;  %s1727_s1 = smov [#allocation12]   ;;  %s68_s19 = int_to_ptr.vmem [resolvable:$true] %s67_s19 }
  0x15   :  { %s91_s20 = sshll.u32 %s1727_s1, 4  ;;  %s1539_s21 = scalar_lea.vmem %s68_s19, 1024  ;;  %s92_s20 = int_to_ptr.vmem [resolvable:$true] %s91_s20 }
  0x16   :  { %p1540_p5 = scmp.ne.s32.totalorder %s68_s19, %s1539_s21  ;;  %p1544_p6 = scmp.lt.s32.totalorder %s68_s19, %s68_s19 }
  0x17   :  { %p1545_p7 = scmp.lt.s32.totalorder %s1539_s21, %s1539_s21 }
  0x19   :  { %49 = dma.hbm_to_vmem [thread:$0]  %s2005_s30, 1024, %s44_s25, [#allocation7], %s1724_s27, %s1724_s27, %s1725_s28  }
  0x1a   :  { %p1546_p8 = por %p1545_p7, %p1544_p6 }
  0x1c   :  { %p1547_p9 = pnand %p1546_p8, %p1540_p5 }
  0x1e   :  { %1550 = shalt.err (!%p1547_p9)
}
  0x1f   :  { %73 = dma.hbm_to_vmem [thread:$0]  %s1988_s3, 1024, %s68_s19, [#allocation10], %s1724_s27, %s1724_s27, %s1725_s28  }
  0x20   :  { %s1559_s24 = scalar_lea.vmem %s92_s20, 1024  ;;  %p1564_p11 = scmp.lt.s32.totalorder %s92_s20, %s92_s20 }
  0x21   :  { %p1560_p10 = scmp.ne.s32.totalorder %s92_s20, %s1559_s24  ;;  %p1565_p12 = scmp.lt.s32.totalorder %s1559_s24, %s1559_s24 }
  0x23   :  { %p1566_p13 = por %p1565_p12, %p1564_p11 }
  0x25   :  { %p1567_p0 = pnand %p1566_p13, %p1560_p10 }
  0x27   :  { %1570 = shalt.err (!%p1567_p0)
}
  0x28   :  { %97 = dma.hbm_to_vmem [thread:$0]  %s1990_s5, 1024, %s92_s20, [#allocation13], %s1724_s27, %s1724_s27, %s1725_s28  }
  0x29   :  { %s1728_s29 = smov [#allocation15]   ;;  %s1729_s30 = smov [#allocation3]  }
  0x2a   :  { %s115_s0 = sshll.u32 %s1728_s29, 4  ;;  %s34_s3 = sshll.u32 %s1729_s30, 4  ;;  %s116_s0 = int_to_ptr.vmem [resolvable:$true] %s115_s0  ;;  %s35_s3 = int_to_ptr.vmem [resolvable:$true] %s34_s3 }
  0x2b   :  { %s1579_s18 = scalar_lea.vmem %s116_s0, 1024  ;;  %p1584_p2 = scmp.lt.s32.totalorder %s116_s0, %s116_s0 }
  0x2c   :  { %p1580_p1 = scmp.ne.s32.totalorder %s116_s0, %s1579_s18  ;;  %p1585_p3 = scmp.lt.s32.totalorder %s1579_s18, %s1579_s18 }
  0x2e   :  { %p1586_p4 = por %p1585_p3, %p1584_p2 }
  0x30   :  { %p1587_p5 = pnand %p1586_p4, %p1580_p1 }
  0x32   :  { %1590 = shalt.err (!%p1587_p5)
}
  0x33   :  { %121 = dma.hbm_to_vmem [thread:$0]  %s1992_s7, 1024, %s116_s0, [#allocation16], %s1724_s27, %s1724_s27, %s1725_s28  }
  0x34   :  { %s1599_s5 = scalar_lea.vmem %s35_s3, 64  ;;  %p1604_p7 = scmp.lt.s32.totalorder %s35_s3, %s35_s3 }
  0x35   :  { %p1600_p6 = scmp.ne.s32.totalorder %s35_s3, %s1599_s5  ;;  %p1605_p8 = scmp.lt.s32.totalorder %s1599_s5, %s1599_s5 }
  0x37   :  { %p1606_p9 = por %p1605_p8, %p1604_p7 }
  0x39   :  { %p1607_p10 = pnand %p1606_p9, %p1600_p6 }
  0x3b   :  { %1610 = shalt.err (!%p1607_p10)
}
  0x3c   :  { %s2006_s22 = sld [smem:[#allocation25_spill]]  ;;  %s1730_s23 = smov [#allocation8]  }
  0x3d   :  { %s55_s24 = sshll.u32 %s1730_s23, 4  ;;  %s1731_s25 = smov [#allocation11]   ;;  %s56_s24 = int_to_ptr.vmem [resolvable:$true] %s55_s24 }
  0x3e   :  { %s79_s26 = sshll.u32 %s1731_s25, 4  ;;  %s1619_s29 = scalar_lea.vmem %s56_s24, 1024  ;;  %s80_s26 = int_to_ptr.vmem [resolvable:$true] %s79_s26 }
  0x3f   :  { %p1620_p11 = scmp.ne.s32.totalorder %s56_s24, %s1619_s29  ;;  %p1624_p12 = scmp.lt.s32.totalorder %s56_s24, %s56_s24 }
  0x40   :  { %p1625_p13 = scmp.lt.s32.totalorder %s1619_s29, %s1619_s29 }
  0x42   :  { %37 = dma.hbm_to_vmem [thread:$0]  %s2006_s22, 64, %s35_s3, [#allocation4]  }
  0x43   :  { %p1626_p0 = por %p1625_p13, %p1624_p12 }
  0x45   :  { %p1627_p1 = pnand %p1626_p0, %p1620_p11 }
  0x47   :  { %1630 = shalt.err (!%p1627_p1)
}
  0x48   :  { %61 = dma.hbm_to_vmem [thread:$0]  %s1987_s2, 1024, %s56_s24, [#allocation7], %s1724_s27, %s1724_s27, %s1725_s28  }
  0x49   :  { %s1639_s30 = scalar_lea.vmem %s80_s26, 1024  ;;  %p1644_p3 = scmp.lt.s32.totalorder %s80_s26, %s80_s26 }
  0x4a   :  { %p1640_p2 = scmp.ne.s32.totalorder %s80_s26, %s1639_s30  ;;  %p1645_p4 = scmp.lt.s32.totalorder %s1639_s30, %s1639_s30 }
  0x4c   :  { %p1646_p5 = por %p1645_p4, %p1644_p3 }
  0x4e   :  { %p1647_p6 = pnand %p1646_p5, %p1640_p2 }
  0x50   :  { %1650 = shalt.err (!%p1647_p6)
}
  0x51   :  { %85 = dma.hbm_to_vmem [thread:$0]  %s1989_s4, 1024, %s80_s26, [#allocation10], %s1724_s27, %s1724_s27, %s1725_s28  }
  0x52   :  { %s1732_s19 = smov [#allocation14]   ;;  %s1733_s5 = smov [#allocation17]  }
  0x53   :  { %s103_s1 = sshll.u32 %s1732_s19, 4  ;;  %s127_s2 = sshll.u32 %s1733_s5, 4  ;;  %s104_s1 = int_to_ptr.vmem [resolvable:$true] %s103_s1  ;;  %s128_s2 = int_to_ptr.vmem [resolvable:$true] %s127_s2 }
  0x54   :  { %s1659_s20 = scalar_lea.vmem %s104_s1, 1024  ;;  %p1664_p8 = scmp.lt.s32.totalorder %s104_s1, %s104_s1 }
  0x55   :  { %p1660_p7 = scmp.ne.s32.totalorder %s104_s1, %s1659_s20  ;;  %p1665_p9 = scmp.lt.s32.totalorder %s1659_s20, %s1659_s20 }
  0x57   :  { %p1666_p10 = por %p1665_p9, %p1664_p8 }
  0x59   :  { %p1667_p11 = pnand %p1666_p10, %p1660_p7 }
  0x5b   :  { %1670 = shalt.err (!%p1667_p11)
}
  0x5c   :  { %109 = dma.hbm_to_vmem [thread:$0]  %s1991_s6, 1024, %s104_s1, [#allocation13], %s1724_s27, %s1724_s27, %s1725_s28  }
  0x5d   :  { %s1679_s4 = scalar_lea.vmem %s128_s2, 1024  ;;  %p1684_p13 = scmp.lt.s32.totalorder %s128_s2, %s128_s2 }
  0x5e   :  { %p1680_p12 = scmp.ne.s32.totalorder %s128_s2, %s1679_s4  ;;  %p1685_p0 = scmp.lt.s32.totalorder %s1679_s4, %s1679_s4 }
  0x60   :  { %p1686_p1 = por %p1685_p0, %p1684_p13 }
  0x62   :  { %p1687_p2 = pnand %p1686_p1, %p1680_p12 }
  0x64   :  { %1690 = shalt.err (!%p1687_p2)
}
  0x65   :  { %133 = dma.hbm_to_vmem [thread:$0]  %s1993_s8, 1024, %s128_s2, [#allocation16], %s1724_s27, %s1724_s27, %s1725_s28  }
  0x66   :  { %1711 = dma.done.wait [#allocation4], 64  }
  0x67   :  { %1712 = vsyncadd [#allocation4], 4294967232 }
  0x68   :  { %1713 = dma.done.wait [#allocation7], 2048  }
  0x69   :  { %1714 = vsyncadd [#allocation7], 4294965248 }
  0x6a   :  { %1715 = dma.done.wait [#allocation10], 2048  }
  0x6b   :  { %1716 = vsyncadd [#allocation10], 4294965248 }
  0x6c   :  { %1717 = dma.done.wait [#allocation13], 2048  }
  0x6d   :  { %1718 = vsyncadd [#allocation13], 4294965248 }
  0x6e   :  { %1719 = dma.done.wait [#allocation16], 2048  }
  0x6f   :  { %1720 = vsyncadd [#allocation16], 4294965248  ;;  %v1734_v0 = vmov 0.0   ;;  %vm1735_vm0 = vmmov 0   ;;  %v1447_v1 = vld [vmem:[#allocation6 + $0x38] sm:$0xff]   ;;  %v1448_v2 = vld [vmem:[#allocation6 + $0x30] sm:$0xff]  }
  0x70   :  { %1273 = vmatprep.subr.bf16.mxu0 %v1734_v0  ;;  %1289 = vmatprep.mubr.msk.bf16.mxu0 %vm1735_vm0, %v1734_v0  ;;  %v1449_v3 = vld [vmem:[#allocation6 + $0x28] sm:$0xff]   ;;  %v1455_v4 = vld [vmem:[#allocation8 + $0x38] sm:$0xff]   ;;  %v1450_v5 = vld [vmem:[#allocation6 + $0x20] sm:$0xff]   ;;  %s1736_s3 = smov [#allocation18]  }
  0x71   :  { %1293 = vmatprep.subr.bf16.mxu1 %v1734_v0  ;;  %1309 = vmatprep.mubr.msk.bf16.mxu1 %vm1735_vm0, %v1734_v0  ;;  %v1456_v6 = vld [vmem:[#allocation8 + $0x30] sm:$0xff]   ;;  %v1451_v7 = vld [vmem:[#allocation6 + $0x18] sm:$0xff]   ;;  %v1457_v8 = vld [vmem:[#allocation8 + $0x28] sm:$0xff]   ;;  %s1116_s18 = sshll.u32 %s1736_s3, 4  ;;  %s1117_s18 = int_to_ptr.vmem [resolvable:$true] %s1116_s18 }
  0x72   :  { %1274 = vmatpush3.bf16.msra.mxu0 %v1447_v1  ;;  %1294 = vmatpush3.bf16.msra.mxu1 %v1455_v4  ;;  %v1452_v9 = vld [vmem:[#allocation6 + $0x10] sm:$0xff]   ;;  %v1458_v10 = vld [vmem:[#allocation8 + $0x20] sm:$0xff]   ;;  %v1453_v11 = vld [vmem:[#allocation6 + $0x8] sm:$0xff]   ;;  %p1696_p4 = scmp.lt.s32.totalorder %s1117_s18, %s1117_s18 }
  0x73   :  { %1275 = vmatprep.subr.bf16.mxu0 %v1734_v0  ;;  %1295 = vmatprep.subr.bf16.mxu1 %v1734_v0  ;;  %v1459_v12 = vld [vmem:[#allocation8 + $0x18] sm:$0xff]   ;;  %v1454_v13 = vld [vmem:[#allocation6] sm:$0xff]   ;;  %v1460_v14 = vld [vmem:[#allocation8 + $0x10] sm:$0xff]  }
  0x74   :  { %v178_v15 = vld [vmem:[#allocation3] sm:$0xf]  ;;  %v1461_v16 = vld [vmem:[#allocation8 + $0x8] sm:$0xff]   ;;  %v1462_v17 = vld [vmem:[#allocation8] sm:$0xff]  }
  0x75   :  { %v1463_v18 = vld [vmem:[#allocation9 + $0x38] sm:$0xff]   ;;  %v1464_v19 = vld [vmem:[#allocation9 + $0x30] sm:$0xff]   ;;  %v1465_v20 = vld [vmem:[#allocation9 + $0x28] sm:$0xff]  }
  0x76   :  { %1276 = vmatpush3.bf16.msra.mxu0 %v1448_v2  ;;  %1296 = vmatpush3.bf16.msra.mxu1 %v1456_v6  ;;  %v1466_v21 = vld [vmem:[#allocation9 + $0x20] sm:$0xff]   ;;  %v1467_v22 = vld [vmem:[#allocation9 + $0x18] sm:$0xff]   ;;  %v1468_v23 = vld [vmem:[#allocation9 + $0x10] sm:$0xff]  }
  0x77   :  { %1277 = vmatprep.subr.bf16.mxu0 %v1734_v0  ;;  %1297 = vmatprep.subr.bf16.mxu1 %v1734_v0  ;;  %v1129_v24 = vld [vmem:[%s1994_s9] ss:$0 sm:$0xff]  ;;  %v1469_v33 = vld [vmem:[#allocation9 + $0x8] sm:$0xff]   ;;  %v1470_v34 = vld [vmem:[#allocation9] sm:$0xff]  }
  0x78   :  { %v1471_v35 = vld [vmem:[#allocation11 + $0x38] sm:$0xff]   ;;  %v1472_v36 = vld [vmem:[#allocation11 + $0x30] sm:$0xff]   ;;  %v1473_v37 = vld [vmem:[#allocation11 + $0x28] sm:$0xff]  }
  0x79   :  { %v1474_v38 = vld [vmem:[#allocation11 + $0x20] sm:$0xff]   ;;  %v1475_v39 = vld [vmem:[#allocation11 + $0x18] sm:$0xff]   ;;  %v1476_v40 = vld [vmem:[#allocation11 + $0x10] sm:$0xff]  }
  0x7a   :  { %1278 = vmatpush3.bf16.msra.mxu0 %v1449_v3  ;;  %1298 = vmatpush3.bf16.msra.mxu1 %v1457_v8  ;;  %v1138_v41 = vld [vmem:[%s1995_s10] ss:$0 sm:$0xff]  ;;  %v1477_v50 = vld [vmem:[#allocation11 + $0x8] sm:$0xff]   ;;  %v1478_v51 = vld [vmem:[#allocation11] sm:$0xff]  }
  0x7b   :  { %1279 = vmatprep.subr.bf16.mxu0 %v1734_v0  ;;  %1299 = vmatprep.subr.bf16.mxu1 %v1734_v0  ;;  %v1479_v52 = vld [vmem:[#allocation12 + $0x38] sm:$0xff]   ;;  %v1480_v53 = vld [vmem:[#allocation12 + $0x30] sm:$0xff]   ;;  %v1481_v54 = vld [vmem:[#allocation12 + $0x28] sm:$0xff]  }
  0x7c   :  { %v1482_v55 = vld [vmem:[#allocation12 + $0x20] sm:$0xff]   ;;  %v1483_v56 = vld [vmem:[#allocation12 + $0x18] sm:$0xff]   ;;  %v1484_v57 = vld [vmem:[#allocation12 + $0x10] sm:$0xff]  }
  0x7d   :  { %v1147_v58 = vld [vmem:[%s1996_s11] ss:$0 sm:$0xff]  ;;  %v1485_v4 = vld [vmem:[#allocation12 + $0x8] sm:$0xff]  }
  0x7e   :  { %1280 = vmatpush3.bf16.msra.mxu0 %v1450_v5  ;;  %1300 = vmatpush3.bf16.msra.mxu1 %v1458_v10  ;;  %v1486_v5 = vld [vmem:[#allocation12] sm:$0xff]   ;;  %v1487_v6 = vld [vmem:[#allocation14 + $0x38] sm:$0xff]   ;;  %v1489_v8 = vld [vmem:[#allocation14 + $0x28] sm:$0xff]  }
  0x7f   :  { %1281 = vmatprep.subr.bf16.mxu0 %v1734_v0  ;;  %1301 = vmatprep.subr.bf16.mxu1 %v1734_v0  ;;  %v1491_v10 = vld [vmem:[#allocation14 + $0x18] sm:$0xff]  }
  0x82   :  { %1282 = vmatpush3.bf16.msra.mxu0 %v1451_v7  ;;  %1302 = vmatpush3.bf16.msra.mxu1 %v1459_v12  ;;  %v1488_v7 = vld [vmem:[#allocation14 + $0x30] sm:$0xff]   ;;  %v1156_v12 = vld [vmem:[%s1997_s12] ss:$0 sm:$0xff] }
  0x83   :  { %1283 = vmatprep.subr.bf16.mxu0 %v1734_v0  ;;  %1303 = vmatprep.subr.bf16.mxu1 %v1734_v0 }
  0x86   :  { %1284 = vmatpush3.bf16.msra.mxu0 %v1452_v9  ;;  %1304 = vmatpush3.bf16.msra.mxu1 %v1460_v14  ;;  %v1490_v9 = vld [vmem:[#allocation14 + $0x20] sm:$0xff]  }
  0x87   :  { %1285 = vmatprep.subr.bf16.mxu0 %v1734_v0  ;;  %1305 = vmatprep.subr.bf16.mxu1 %v1734_v0 }
  0x8a   :  { %1286 = vmatpush3.bf16.msra.mxu0 %v1453_v11  ;;  %1306 = vmatpush3.bf16.msra.mxu1 %v1461_v16  ;;  %v1492_v11 = vld [vmem:[#allocation14 + $0x10] sm:$0xff]  }
  0x8b   :  { %1287 = vmatprep.subr.bf16.mxu0 %v1734_v0  ;;  %1307 = vmatprep.subr.bf16.mxu1 %v1734_v0 }
  0x8e   :  { %1288 = vmatpush3.bf16.msra.mxu0 %v1454_v13  ;;  %1308 = vmatpush3.bf16.msra.mxu1 %v1462_v17 }
  0x8f   :  { %1313 = vmatprep.subr.bf16.mxu0 %v1734_v0  ;;  %1333 = vmatprep.subr.bf16.mxu1 %v1734_v0 }
  0x91   :  { %1290 = vmatmul.mubr.bf16.vlgmr.msra.gmra.mxu0 %v178_v15 }
  0x92   :  { %1329 = vmatprep.mubr.msk.bf16.mxu0 %vm1735_vm0, %v1734_v0  ;;  %1314 = vmatpush3.bf16.msra.mxu0 %v1463_v18 }
  0x93   :  { %1315 = vmatprep.subr.bf16.mxu0 %v1734_v0 }
  0x96   :  { %1316 = vmatpush3.bf16.msra.mxu0 %v1464_v19 }
  0x97   :  { %1317 = vmatprep.subr.bf16.mxu0 %v1734_v0 }
  0x9a   :  { %1318 = vmatpush3.bf16.msra.mxu0 %v1465_v20 }
  0x9b   :  { %1319 = vmatprep.subr.bf16.mxu0 %v1734_v0 }
  0x9e   :  { %1320 = vmatpush3.bf16.msra.mxu0 %v1466_v21  ;;  %v1493_v21 = vld [vmem:[#allocation14 + $0x8] sm:$0xff]  }
  0x9f   :  { %1321 = vmatprep.subr.bf16.mxu0 %v1734_v0 }
  0xa2   :  { %1322 = vmatpush3.bf16.msra.mxu0 %v1467_v22  ;;  %v1494_v22 = vld [vmem:[#allocation14] sm:$0xff]  }
  0xa3   :  { %1323 = vmatprep.subr.bf16.mxu0 %v1734_v0 }
  0xa6   :  { %1324 = vmatpush3.bf16.msra.mxu0 %v1468_v23  ;;  %v1495_v23 = vld [vmem:[#allocation15 + $0x38] sm:$0xff]  }
  0xa7   :  { %1325 = vmatprep.subr.bf16.mxu0 %v1734_v0 }
  0xaa   :  { %1326 = vmatpush3.bf16.msra.mxu0 %v1469_v33 }
  0xab   :  { %1327 = vmatprep.subr.bf16.mxu0 %v1734_v0 }
  0xae   :  { %1328 = vmatpush3.bf16.msra.mxu0 %v1470_v34 }
  0xaf   :  { %1353 = vmatprep.subr.bf16.mxu0 %v1734_v0 }
 0x151   :  { %v284_v25 = vpop.f32.mrf.mxu0 }
 0x152   :  { %v285_v26 = vadd.f32 %v1129_v24, %v284_v25  ;;  %v1496_v24 = vld [vmem:[#allocation15 + $0x30] sm:$0xff]   ;;  %v1497_v25 = vld [vmem:[#allocation15 + $0x28] sm:$0xff]  }
 0x153   :  { %v1291_v27 = vpop.f32.mrf.mxu0 }
 0x154   :  { %vm290_vm1 = vcmp.gt.f32.partialorder %v285_v26, 0.0  ;;  %v291_v28 = vmul.f32 0.2, %v285_v26  ;;  %v1499_v27 = vld [vmem:[#allocation15 + $0x18] sm:$0xff]  }
 0x155   :  { %v287_v29 = vpop.f32.mrf.mxu0 }
 0x156   :  { %v292_v30 = vsel %vm290_vm1, %v285_v26, %v291_v28  ;;  %v1498_v26 = vld [vmem:[#allocation15 + $0x20] sm:$0xff]   ;;  %v1500_v28 = vld [vmem:[#allocation15 + $0x10] sm:$0xff]   ;;  %v1165_v29 = vld [vmem:[%s1998_s13] ss:$0 sm:$0xff] }
 0x157   :  { %v1292_v31 = vpop.f32.mrf.mxu0  ;;  %v295_v32 = vpack.c.bf16 %v292_v30, %v292_v30 }
 0x159   :  { %1310 = vmatmul.mubr.bf16.vlgmr.msra.gmra.mxu1 %v295_v32 }
 0x15a   :  { %1349 = vmatprep.mubr.msk.bf16.mxu1 %vm1735_vm0, %v1734_v0  ;;  %1334 = vmatpush3.bf16.msra.mxu1 %v1471_v35 }
 0x15b   :  { %1335 = vmatprep.subr.bf16.mxu1 %v1734_v0 }
 0x15e   :  { %1336 = vmatpush3.bf16.msra.mxu1 %v1472_v36 }
 0x15f   :  { %1337 = vmatprep.subr.bf16.mxu1 %v1734_v0 }
 0x162   :  { %1338 = vmatpush3.bf16.msra.mxu1 %v1473_v37 }
 0x163   :  { %1339 = vmatprep.subr.bf16.mxu1 %v1734_v0 }
 0x166   :  { %1340 = vmatpush3.bf16.msra.mxu1 %v1474_v38  ;;  %v1501_v38 = vld [vmem:[#allocation15 + $0x8] sm:$0xff]  }
 0x167   :  { %1341 = vmatprep.subr.bf16.mxu1 %v1734_v0 }
 0x16a   :  { %1342 = vmatpush3.bf16.msra.mxu1 %v1475_v39  ;;  %v1502_v39 = vld [vmem:[#allocation15] sm:$0xff]  }
 0x16b   :  { %1343 = vmatprep.subr.bf16.mxu1 %v1734_v0 }
 0x16e   :  { %1344 = vmatpush3.bf16.msra.mxu1 %v1476_v40  ;;  %v1503_v40 = vld [vmem:[#allocation17 + $0x38] sm:$0xff]  }
 0x16f   :  { %1345 = vmatprep.subr.bf16.mxu1 %v1734_v0 }
 0x172   :  { %1346 = vmatpush3.bf16.msra.mxu1 %v1477_v50 }
 0x173   :  { %1347 = vmatprep.subr.bf16.mxu1 %v1734_v0 }
 0x176   :  { %1348 = vmatpush3.bf16.msra.mxu1 %v1478_v51 }
 0x177   :  { %1373 = vmatprep.subr.bf16.mxu1 %v1734_v0 }
 0x219   :  { %v401_v42 = vpop.f32.mrf.mxu1 }
 0x21a   :  { %v402_v43 = vadd.f32 %v1138_v41, %v401_v42  ;;  %v1504_v41 = vld [vmem:[#allocation17 + $0x30] sm:$0xff]   ;;  %v1505_v42 = vld [vmem:[#allocation17 + $0x28] sm:$0xff]  }
 0x21b   :  { %v1311_v44 = vpop.f32.mrf.mxu1 }
 0x21c   :  { %vm407_vm2 = vcmp.gt.f32.partialorder %v402_v43, 0.0  ;;  %v408_v45 = vmul.f32 0.2, %v402_v43  ;;  %v1507_v44 = vld [vmem:[#allocation17 + $0x18] sm:$0xff]  }
 0x21d   :  { %v404_v46 = vpop.f32.mrf.mxu1 }
 0x21e   :  { %v409_v47 = vsel %vm407_vm2, %v402_v43, %v408_v45  ;;  %v1506_v43 = vld [vmem:[#allocation17 + $0x20] sm:$0xff]   ;;  %v1508_v45 = vld [vmem:[#allocation17 + $0x10] sm:$0xff]   ;;  %v1174_v46 = vld [vmem:[%s1999_s14] ss:$0 sm:$0xff] }
 0x21f   :  { %v412_v48 = vpack.c.bf16 %v409_v47, %v409_v47  ;;  %v1312_v49 = vpop.f32.mrf.mxu1 }
 0x221   :  { %1330 = vmatmul.mubr.bf16.vlgmr.msra.gmra.mxu0 %v412_v48 }
 0x222   :  { %1369 = vmatprep.mubr.msk.bf16.mxu0 %vm1735_vm0, %v1734_v0  ;;  %1354 = vmatpush3.bf16.msra.mxu0 %v1479_v52 }
 0x223   :  { %1355 = vmatprep.subr.bf16.mxu0 %v1734_v0 }
 0x226   :  { %1356 = vmatpush3.bf16.msra.mxu0 %v1480_v53 }
 0x227   :  { %1357 = vmatprep.subr.bf16.mxu0 %v1734_v0 }
 0x22a   :  { %1358 = vmatpush3.bf16.msra.mxu0 %v1481_v54 }
 0x22b   :  { %1359 = vmatprep.subr.bf16.mxu0 %v1734_v0 }
 0x22e   :  { %1360 = vmatpush3.bf16.msra.mxu0 %v1482_v55  ;;  %v1509_v55 = vld [vmem:[#allocation17 + $0x8] sm:$0xff]  }
 0x22f   :  { %1361 = vmatprep.subr.bf16.mxu0 %v1734_v0 }
 0x232   :  { %1362 = vmatpush3.bf16.msra.mxu0 %v1483_v56  ;;  %v1510_v56 = vld [vmem:[#allocation17] sm:$0xff]  }
 0x233   :  { %1363 = vmatprep.subr.bf16.mxu0 %v1734_v0 }
 0x236   :  { %1364 = vmatpush3.bf16.msra.mxu0 %v1484_v57  ;;  %v1183_v57 = vld [vmem:[%s2000_s15] ss:$0 sm:$0xff]  ;;  %s1691_s15 = scalar_lea.vmem %s1117_s18, 128 }
 0x237   :  { %1365 = vmatprep.subr.bf16.mxu0 %v1734_v0  ;;  %p1692_p3 = scmp.ne.s32.totalorder %s1117_s18, %s1691_s15  ;;  %p1697_p5 = scmp.lt.s32.totalorder %s1691_s15, %s1691_s15 }
 0x239   :  { %p1698_p6 = por %p1697_p5, %p1696_p4 }
 0x23a   :  { %1366 = vmatpush3.bf16.msra.mxu0 %v1485_v4 }
 0x23b   :  { %1367 = vmatprep.subr.bf16.mxu0 %v1734_v0  ;;  %p1699_p7 = pnand %p1698_p6, %p1692_p3 }
 0x23e   :  { %1368 = vmatpush3.bf16.msra.mxu0 %v1486_v5 }
 0x23f   :  { %1393 = vmatprep.subr.bf16.mxu0 %v1734_v0 }
 0x2e1   :  { %v518_v59 = vpop.f32.mrf.mxu0 }
 0x2e2   :  { %v519_v60 = vadd.f32 %v1147_v58, %v518_v59 }
 0x2e3   :  { %v1331_v61 = vpop.f32.mrf.mxu0 }
 0x2e4   :  { %vm524_vm3 = vcmp.gt.f32.partialorder %v519_v60, 0.0  ;;  %v525_v62 = vmul.f32 0.2, %v519_v60 }
 0x2e5   :  { %v521_v63 = vpop.f32.mrf.mxu0 }
 0x2e6   :  { %v526_v1 = vsel %vm524_vm3, %v519_v60, %v525_v62 }
 0x2e7   :  { %v529_v2 = vpack.c.bf16 %v526_v1, %v526_v1  ;;  %v1332_v3 = vpop.f32.mrf.mxu0 }
 0x2e9   :  { %1350 = vmatmul.mubr.bf16.vlgmr.msra.gmra.mxu1 %v529_v2 }
 0x2ea   :  { %1389 = vmatprep.mubr.msk.bf16.mxu1 %vm1735_vm0, %v1734_v0  ;;  %1374 = vmatpush3.bf16.msra.mxu1 %v1487_v6 }
 0x2eb   :  { %1375 = vmatprep.subr.bf16.mxu1 %v1734_v0 }
 0x2ee   :  { %1376 = vmatpush3.bf16.msra.mxu1 %v1488_v7 }
 0x2ef   :  { %1377 = vmatprep.subr.bf16.mxu1 %v1734_v0 }
 0x2f2   :  { %1378 = vmatpush3.bf16.msra.mxu1 %v1489_v8 }
 0x2f3   :  { %1379 = vmatprep.subr.bf16.mxu1 %v1734_v0 }
 0x2f6   :  { %1380 = vmatpush3.bf16.msra.mxu1 %v1490_v9 }
 0x2f7   :  { %1381 = vmatprep.subr.bf16.mxu1 %v1734_v0 }
 0x2fa   :  { %1382 = vmatpush3.bf16.msra.mxu1 %v1491_v10 }
 0x2fb   :  { %1383 = vmatprep.subr.bf16.mxu1 %v1734_v0 }
 0x2fe   :  { %1384 = vmatpush3.bf16.msra.mxu1 %v1492_v11 }
 0x2ff   :  { %1385 = vmatprep.subr.bf16.mxu1 %v1734_v0 }
 0x302   :  { %1386 = vmatpush3.bf16.msra.mxu1 %v1493_v21 }
 0x303   :  { %1387 = vmatprep.subr.bf16.mxu1 %v1734_v0 }
 0x306   :  { %1388 = vmatpush3.bf16.msra.mxu1 %v1494_v22 }
 0x307   :  { %1413 = vmatprep.subr.bf16.mxu1 %v1734_v0 }
 0x3a9   :  { %v635_v13 = vpop.f32.mrf.mxu1 }
 0x3aa   :  { %v636_v14 = vadd.f32 %v1156_v12, %v635_v13 }
 0x3ab   :  { %v1351_v15 = vpop.f32.mrf.mxu1 }
 0x3ac   :  { %vm641_vm4 = vcmp.gt.f32.partialorder %v636_v14, 0.0  ;;  %v642_v16 = vmul.f32 0.2, %v636_v14 }
 0x3ad   :  { %v638_v17 = vpop.f32.mrf.mxu1 }
 0x3ae   :  { %v643_v18 = vsel %vm641_vm4, %v636_v14, %v642_v16 }
 0x3af   :  { %v646_v19 = vpack.c.bf16 %v643_v18, %v643_v18  ;;  %v1352_v20 = vpop.f32.mrf.mxu1 }
 0x3b1   :  { %1370 = vmatmul.mubr.bf16.vlgmr.msra.gmra.mxu0 %v646_v19 }
 0x3b2   :  { %1409 = vmatprep.mubr.msk.bf16.mxu0 %vm1735_vm0, %v1734_v0  ;;  %1394 = vmatpush3.bf16.msra.mxu0 %v1495_v23 }
 0x3b3   :  { %1395 = vmatprep.subr.bf16.mxu0 %v1734_v0 }
 0x3b6   :  { %1396 = vmatpush3.bf16.msra.mxu0 %v1496_v24 }
 0x3b7   :  { %1397 = vmatprep.subr.bf16.mxu0 %v1734_v0 }
 0x3ba   :  { %1398 = vmatpush3.bf16.msra.mxu0 %v1497_v25 }
 0x3bb   :  { %1399 = vmatprep.subr.bf16.mxu0 %v1734_v0 }
 0x3be   :  { %1400 = vmatpush3.bf16.msra.mxu0 %v1498_v26 }
 0x3bf   :  { %1401 = vmatprep.subr.bf16.mxu0 %v1734_v0 }
 0x3c2   :  { %1402 = vmatpush3.bf16.msra.mxu0 %v1499_v27 }
 0x3c3   :  { %1403 = vmatprep.subr.bf16.mxu0 %v1734_v0 }
 0x3c6   :  { %1404 = vmatpush3.bf16.msra.mxu0 %v1500_v28 }
 0x3c7   :  { %1405 = vmatprep.subr.bf16.mxu0 %v1734_v0 }
 0x3ca   :  { %1406 = vmatpush3.bf16.msra.mxu0 %v1501_v38 }
 0x3cb   :  { %1407 = vmatprep.subr.bf16.mxu0 %v1734_v0 }
 0x3ce   :  { %1408 = vmatpush3.bf16.msra.mxu0 %v1502_v39 }
 0x471   :  { %v752_v30 = vpop.f32.mrf.mxu0 }
 0x472   :  { %v753_v31 = vadd.f32 %v1165_v29, %v752_v30 }
 0x473   :  { %v1371_v32 = vpop.f32.mrf.mxu0 }
 0x474   :  { %vm758_vm5 = vcmp.gt.f32.partialorder %v753_v31, 0.0  ;;  %v759_v33 = vmul.f32 0.2, %v753_v31 }
 0x475   :  { %v755_v34 = vpop.f32.mrf.mxu0 }
 0x476   :  { %v760_v35 = vsel %vm758_vm5, %v753_v31, %v759_v33 }
 0x477   :  { %v763_v36 = vpack.c.bf16 %v760_v35, %v760_v35  ;;  %v1372_v37 = vpop.f32.mrf.mxu0 }
 0x479   :  { %1390 = vmatmul.mubr.bf16.vlgmr.msra.gmra.mxu1 %v763_v36 }
 0x47a   :  { %1429 = vmatprep.mubr.msk.bf16.mxu1 %vm1735_vm0, %v1734_v0  ;;  %1414 = vmatpush3.bf16.msra.mxu1 %v1503_v40 }
 0x47b   :  { %1415 = vmatprep.subr.bf16.mxu1 %v1734_v0 }
 0x47e   :  { %1416 = vmatpush3.bf16.msra.mxu1 %v1504_v41 }
 0x47f   :  { %1417 = vmatprep.subr.bf16.mxu1 %v1734_v0 }
 0x482   :  { %1418 = vmatpush3.bf16.msra.mxu1 %v1505_v42 }
 0x483   :  { %1419 = vmatprep.subr.bf16.mxu1 %v1734_v0 }
 0x486   :  { %1420 = vmatpush3.bf16.msra.mxu1 %v1506_v43 }
 0x487   :  { %1421 = vmatprep.subr.bf16.mxu1 %v1734_v0 }
 0x48a   :  { %1422 = vmatpush3.bf16.msra.mxu1 %v1507_v44 }
 0x48b   :  { %1423 = vmatprep.subr.bf16.mxu1 %v1734_v0 }
 0x48e   :  { %1424 = vmatpush3.bf16.msra.mxu1 %v1508_v45 }
 0x48f   :  { %1425 = vmatprep.subr.bf16.mxu1 %v1734_v0 }
 0x492   :  { %1426 = vmatpush3.bf16.msra.mxu1 %v1509_v55 }
 0x493   :  { %1427 = vmatprep.subr.bf16.mxu1 %v1734_v0  ;;  %v1192_v0 = vld [vmem:[%s2001_s16] ss:$0 sm:$0xff] }
 0x496   :  { %1428 = vmatpush3.bf16.msra.mxu1 %v1510_v56 }
 0x539   :  { %v869_v47 = vpop.f32.mrf.mxu1 }
 0x53a   :  { %v870_v48 = vadd.f32 %v1174_v46, %v869_v47 }
 0x53b   :  { %v1391_v49 = vpop.f32.mrf.mxu1 }
 0x53c   :  { %vm875_vm6 = vcmp.gt.f32.partialorder %v870_v48, 0.0  ;;  %v876_v50 = vmul.f32 0.2, %v870_v48 }
 0x53d   :  { %v872_v51 = vpop.f32.mrf.mxu1 }
 0x53e   :  { %v877_v52 = vsel %vm875_vm6, %v870_v48, %v876_v50 }
 0x53f   :  { %v880_v53 = vpack.c.bf16 %v877_v52, %v877_v52  ;;  %v1392_v54 = vpop.f32.mrf.mxu1 }
 0x541   :  { %1410 = vmatmul.mubr.bf16.vlgmr.msra.gmra.mxu0 %v880_v53 }
 0x601   :  { %v986_v58 = vpop.f32.mrf.mxu0 }
 0x602   :  { %v987_v59 = vadd.f32 %v1183_v57, %v986_v58 }
 0x603   :  { %v1411_v60 = vpop.f32.mrf.mxu0 }
 0x604   :  { %vm992_vm7 = vcmp.gt.f32.partialorder %v987_v59, 0.0  ;;  %v993_v61 = vmul.f32 0.2, %v987_v59 }
 0x605   :  { %v989_v62 = vpop.f32.mrf.mxu0 }
 0x606   :  { %v994_v63 = vsel %vm992_vm7, %v987_v59, %v993_v61 }
 0x607   :  { %v997_v1 = vpack.c.bf16 %v994_v63, %v994_v63  ;;  %v1412_v2 = vpop.f32.mrf.mxu0 }
 0x609   :  { %1430 = vmatmul.mubr.bf16.vlgmr.msra.gmra.mxu1 %v997_v1 }
 0x6c9   :  { %v1103_v3 = vpop.f32.mrf.mxu1 }
 0x6ca   :  { %v1104_v4 = vadd.f32 %v1192_v0, %v1103_v3 }
 0x6cb   :  { %v1431_v5 = vpop.f32.mrf.mxu1 }
 0x6cc   :  { %1109 = vst [vmem:[#allocation18] sm:$0xff] %v1104_v4 }
 0x6cd   :  { %v1106_v6 = vpop.f32.mrf.mxu1 }
 0x6ce   :  { %1702 = shalt.err (!%p1699_p7)
}
 0x6cf   :  { %1119 = dma.vmem_to_hbm [thread:$0]  %s1117_s18, 128, %s2002_s17, [#allocation5]   ;;  %v1432_v7 = vpop.f32.mrf.mxu1 }
 0x6d0   :  { %1721 = dma.done.wait [#allocation5], 128  }
 0x6d1   :  { %1722 = vsyncadd [#allocation5], 4294967168 }
 0x6d2   :  { %1123 = vsyncpa [#allocation4], 1 }
 0x6d3   :  { %1124 = vsyncpa [#allocation7], 1 }
 0x6d4   :  { %1125 = vsyncpa [#allocation10], 1 }
 0x6d5   :  { %1126 = vsyncpa [#allocation13], 1 }
 0x6d6   :  { %1127 = vsyncpa [#allocation16], 1 }
 0x6d7   :  { %1128 = vsyncpa [#allocation5], 1 }

</bundles_post_ra>
